<compile_context>
chip_gen: v7x
topology: tpu7x:2x2x1
jax: 0.10.0
libtpu: 0.0.40
codegen_flags: <defaults>
</compile_context>

<pallas_src>
import functools

import jax
import jax.numpy as jnp
import numpy as np
from jax.experimental import pallas as pl
from jax.experimental.pallas import tpu as pltpu


def _make_tap_masks(H, W, n_img):
    """(9, n_img*H*W) f32 validity mask per 3x3 tap (1 inside the image, 0 = zero pad).

    The masks also zero any lane-roll that wraps across an image boundary when
    several images are fused on the lane axis, so no extra in-kernel logic is
    needed for the batch fold.
    """
    m = np.zeros((9, H, W), np.float32)
    for kh in range(3):
        for kw in range(3):
            dh, dw = kh - 1, kw - 1
            r0, r1 = max(0, -dh), min(H, H - dh)
            c0, c1 = max(0, -dw), min(W, W - dw)
            m[kh * 3 + kw, r0:r1, c0:c1] = 1.0
    m = m.reshape(9, H * W)
    return np.tile(m, (1, n_img))


def _conv_add_cumsum_kernel(x_ref, x2_ref, w_ref, m_ref, o_ref, im2col_ref, *, W):
    """One lane-block (NB images fused on the lane axis) per grid step.

    x_ref     : (Cin, L)   f32   input, channels on sublanes, L = NB*H*W lanes
    x2_ref    : (Cout, L)  f32   additive tensor
    w_ref     : (Cout, 32) f32   cols t*Cin+cin = conv taps, col 27 = bias, rest 0
    m_ref     : (9, L)     f32   per-tap validity masks (tiled per image)
    o_ref     : (Cout, L)  int32 output (channel cumsum)
    im2col_ref: (32, L)    f32   VMEM scratch holding the stacked taps
    """
    Cin, L = x_ref.shape
    Cout, Kpad = w_ref.shape

    x = x_ref[...]

    # --- Build the (Kpad, L) im2col operand: 9 rolled+masked taps, a ones row for
    #     the bias, and zero rows padding K up to a multiple of 8.
    for kh in range(3):
        for kw in range(3):
            dh, dw = kh - 1, kw - 1
            d = dh * W + dw                      # source offset along the fused lane axis
            t = kh * 3 + kw
            if d == 0:
                tap = x                          # center tap: always valid, no mask
            else:
                # tap[:, p] = x[:, p + d]; wrapped / out-of-image lanes are zeroed.
                tap = pltpu.roll(x, shift=(-d) % L, axis=1) * m_ref[t:t + 1, :]
            im2col_ref[t * Cin:(t + 1) * Cin, :] = tap
    im2col_ref[9 * Cin:9 * Cin + 1, :] = jnp.ones((1, L), jnp.float32)   # bias row
    n_pad = Kpad - 9 * Cin - 1
    if n_pad:
        im2col_ref[9 * Cin + 1:Kpad, :] = jnp.zeros((n_pad, L), jnp.float32)

    # --- conv + bias in ONE MXU matmul; x2 folded into the accumulator.
    acc = x2_ref[...] + jnp.dot(w_ref[...], im2col_ref[...],
                                preferred_element_type=jnp.float32)      # (Cout, L)

    v = acc.astype(jnp.int32)        # torch .to(torch.int): truncate toward zero

    # --- Channel cumsum = lower-triangular-ones matmul on the (otherwise idle) MXU,
    #     then a single unmasked full-block store.  Exact for |values| < 2^24.
    r = jax.lax.broadcasted_iota(jnp.int32, (Cout, Cout), 0)
    c = jax.lax.broadcasted_iota(jnp.int32, (Cout, Cout), 1)
    tri = (c <= r).astype(jnp.float32)                                   # (Cout, Cout)
    cum = jnp.dot(tri, v.astype(jnp.float32),
                  preferred_element_type=jnp.float32)                    # (Cout, L)
    o_ref[...] = cum.astype(jnp.int32)


def _num_parallel_blocks(n_batch):
    """2-way 'parallel' batch split on 2-TensorCore chips (v7x); fully fused otherwise."""
    try:
        kind = jax.local_devices()[0].device_kind.lower()
    except Exception:
        kind = ""
    two_tc = "v7" in kind
    return 2 if (two_tc and n_batch % 2 == 0) else 1


@functools.partial(jax.jit, static_argnames=("num_blocks",))
def model_forward(x_nchw, x2_nchw, weight_oihw, bias, *, num_blocks=1):
    """Matches PyTorch Model.forward (with the intended `v1 + x2`).

    x_nchw:  (N, Cin, H, W) float32
    x2_nchw: (N, Cout, H, W) float32
    weight_oihw: (Cout, Cin, 3, 3) float32
    bias: (Cout,) float32
    returns: (N, Cout, H, W) int32
    """
    N, Cin, H, W = x_nchw.shape
    Cout = weight_oihw.shape[0]
    HW = H * W

    G = num_blocks if (num_blocks > 0 and N % num_blocks == 0) else 1
    NB = N // G                 # images fused per lane block
    L = NB * HW                 # lanes per grid step

    # Layout plumbing: channels -> sublanes, (batch, H, W) flattened -> lanes.
    x_f = jnp.transpose(x_nchw.reshape(N, Cin, HW), (1, 0, 2)).reshape(Cin, N * HW)
    x2_f = jnp.transpose(x2_nchw.reshape(N, Cout, HW), (1, 0, 2)).reshape(Cout, N * HW)

    # (Cout, Kpad): cols t*Cin+cin = conv taps, col 9*Cin = bias, remaining cols = 0.
    Kpad = ((9 * Cin + 1 + 7) // 8) * 8
    w27 = jnp.transpose(weight_oihw, (0, 2, 3, 1)).reshape(Cout, 9 * Cin)
    w_ext = jnp.concatenate(
        [w27, bias.reshape(Cout, 1),
         jnp.zeros((Cout, Kpad - 9 * Cin - 1), jnp.float32)], axis=1)

    masks = jnp.asarray(_make_tap_masks(H, W, NB))        # (9, L), compile-time constant

    kernel = functools.partial(_conv_add_cumsum_kernel, W=W)

    cost = pl.CostEstimate(
        flops=2 * N * Cout * (9 * Cin + 1) * HW + 2 * N * Cout * Cout * HW,
        transcendentals=0,
        bytes_accessed=4 * (x_f.size + x2_f.size + w_ext.size + masks.size
                            + Cout * N * HW))

    out_f = pl.pallas_call(
        kernel,
        out_shape=jax.ShapeDtypeStruct((Cout, N * HW), jnp.int32),
        grid_spec=pltpu.PrefetchScalarGridSpec(
            num_scalar_prefetch=0,
            grid=(G,),
            in_specs=[
                pl.BlockSpec((Cin, L), lambda g: (0, g)),
                pl.BlockSpec((Cout, L), lambda g: (0, g)),
                pl.BlockSpec((Cout, Kpad), lambda g: (0, 0)),
                pl.BlockSpec((9, L), lambda g: (0, 0)),
            ],
            out_specs=pl.BlockSpec((Cout, L), lambda g: (0, g)),
            scratch_shapes=[pltpu.VMEM((Kpad, L), jnp.float32)],
        ),
        compiler_params=pltpu.CompilerParams(
            dimension_semantics=("parallel",)),
        cost_estimate=cost,
    )(x_f, x2_f, w_ext, masks)

    # (Cout, N*HW) -> (N, Cout, H, W); cumsum axis is already the channel axis.
    return jnp.transpose(out_f.reshape(Cout, N, H, W), (1, 0, 2, 3))


def _reference(x_nchw, x2_nchw, weight_oihw, bias):
    """Plain-JAX reference of the same forward pass."""
    v1 = jax.lax.conv_general_dilated(
        x_nchw, weight_oihw, window_strides=(1, 1), padding=((1, 1), (1, 1)),
        dimension_numbers=("NCHW", "OIHW", "NCHW"))
    v1 = v1 + bias.reshape(1, -1, 1, 1)
    v2 = v1 + x2_nchw
    return jnp.cumsum(v2.astype(jnp.int32), axis=1)


if __name__ == "__main__":
    key = jax.random.PRNGKey(0)
    k1, k2, k3, k4 = jax.random.split(key, 4)

    N, Cin, Cout, H, W = 2, 3, 8, 16, 16

    # Quarter-integer valued inputs/parameters: every intermediate value of the
    # conv / add / truncate / cumsum chain is exactly representable, so the kernel
    # must match the plain-JAX reference bit-exactly regardless of accumulation
    # order or MXU operand precision.
    x = jax.random.randint(k1, (N, Cin, H, W), -8, 8).astype(jnp.float32) / 4.0
    x2 = jax.random.randint(k2, (N, Cout, H, W), -8, 8).astype(jnp.float32) / 4.0
    weight = jax.random.randint(k3, (Cout, Cin, 3, 3), -4, 5).astype(jnp.float32) / 4.0
    bias = jax.random.randint(k4, (Cout,), -4, 5).astype(jnp.float32) / 4.0

    nb = _num_parallel_blocks(N)
    out = model_forward(x, x2, weight, bias, num_blocks=nb)
    out = jax.block_until_ready(out)

    assert out.shape == (N, Cout, H, W), out.shape
    assert out.dtype == jnp.int32, out.dtype

    ref = np.asarray(_reference(x, x2, weight, bias))
    got = np.asarray(out)
    assert np.array_equal(got, ref), (
        f"mismatch: match_frac={np.mean(got == ref):.4f}, "
        f"max|diff|={np.abs(got - ref).max()}")

    print("KERNEL_OK")
</pallas_src>

<mosaic_0001>
module attributes {stable_mosaic.version = 11 : i64} {
  func.func @_conv_add_cumsum_kernel(%arg0: i32, %arg1: memref<3x512xf32, #tpu.memory_space<vmem>>, %arg2: memref<8x512xf32, #tpu.memory_space<vmem>>, %arg3: memref<8x32xf32, #tpu.memory_space<vmem>>, %arg4: memref<9x512xf32, #tpu.memory_space<vmem>>, %arg5: memref<8x512xi32, #tpu.memory_space<vmem>>, %arg6: memref<32x512xf32, #tpu.memory_space<vmem>>) attributes {dimension_semantics = [#tpu.dimension_semantics<parallel>], iteration_bounds = array<i64: 1>, scalar_prefetch = 0 : i64, scratch_operands = 1 : i64, tpu.core_type = #tpu.core_type<tc>, window_params = [{transform_indices = @transform_0, window_bounds = array<i64: 3, 512>}, {transform_indices = @transform_1, window_bounds = array<i64: 8, 512>}, {pipeline_mode = #tpu.pipeline_mode<synchronous>, transform_indices = @transform_2, window_bounds = array<i64: 8, 32>}, {pipeline_mode = #tpu.pipeline_mode<synchronous>, transform_indices = @transform_3, window_bounds = array<i64: 9, 512>}, {transform_indices = @transform_4, window_bounds = array<i64: 8, 512>}]} {
    %c0 = arith.constant 0 : index
    %c0_0 = arith.constant 0 : index
    %0 = vector.load %arg1[%c0, %c0_0] : memref<3x512xf32, #tpu.memory_space<vmem>>, vector<3x512xf32>
    %c17_i32 = arith.constant 17 : i32
    %1 = tpu.dynamic_rotate %0 by %c17_i32 dim 1 : vector<3x512xf32>, i32 -> vector<3x512xf32>
    %c0_1 = arith.constant 0 : index
    %c0_2 = arith.constant 0 : index
    %2 = vector.load %arg4[%c0_1, %c0_2] : memref<9x512xf32, #tpu.memory_space<vmem>>, vector<1x512xf32>
    %3 = vector.broadcast %2 : vector<1x512xf32> to vector<3x512xf32>
    %4 = arith.mulf %1, %3 : vector<3x512xf32>
    %c0_3 = arith.constant 0 : index
    %c0_4 = arith.constant 0 : index
    %5 = vector.load %arg6[%c0_3, %c0_4] : memref<32x512xf32, #tpu.memory_space<vmem>>, vector<3x512xf32>
    tpu.vector_store %arg6[%c0_3, %c0_4], %4 {strides = array<i32>} : memref<32x512xf32, #tpu.memory_space<vmem>>, vector<3x512xf32>,
    %c16_i32 = arith.constant 16 : i32
    %6 = tpu.dynamic_rotate %0 by %c16_i32 dim 1 : vector<3x512xf32>, i32 -> vector<3x512xf32>
    %c1 = arith.constant 1 : index
    %c0_5 = arith.constant 0 : index
    %7 = vector.load %arg4[%c1, %c0_5] : memref<9x512xf32, #tpu.memory_space<vmem>>, vector<1x512xf32>
    %8 = vector.broadcast %7 : vector<1x512xf32> to vector<3x512xf32>
    %9 = arith.mulf %6, %8 : vector<3x512xf32>
    %c3 = arith.constant 3 : index
    %c0_6 = arith.constant 0 : index
    %10 = vector.load %arg6[%c3, %c0_6] : memref<32x512xf32, #tpu.memory_space<vmem>>, vector<3x512xf32>
    tpu.vector_store %arg6[%c3, %c0_6], %9 {strides = array<i32>} : memref<32x512xf32, #tpu.memory_space<vmem>>, vector<3x512xf32>,
    %c15_i32 = arith.constant 15 : i32
    %11 = tpu.dynamic_rotate %0 by %c15_i32 dim 1 : vector<3x512xf32>, i32 -> vector<3x512xf32>
    %c2 = arith.constant 2 : index
    %c0_7 = arith.constant 0 : index
    %12 = vector.load %arg4[%c2, %c0_7] : memref<9x512xf32, #tpu.memory_space<vmem>>, vector<1x512xf32>
    %13 = vector.broadcast %12 : vector<1x512xf32> to vector<3x512xf32>
    %14 = arith.mulf %11, %13 : vector<3x512xf32>
    %c6 = arith.constant 6 : index
    %c0_8 = arith.constant 0 : index
    %15 = vector.load %arg6[%c6, %c0_8] : memref<32x512xf32, #tpu.memory_space<vmem>>, vector<3x512xf32>
    tpu.vector_store %arg6[%c6, %c0_8], %14 {strides = array<i32>} : memref<32x512xf32, #tpu.memory_space<vmem>>, vector<3x512xf32>,
    %c1_i32 = arith.constant 1 : i32
    %16 = tpu.dynamic_rotate %0 by %c1_i32 dim 1 : vector<3x512xf32>, i32 -> vector<3x512xf32>
    %c3_9 = arith.constant 3 : index
    %c0_10 = arith.constant 0 : index
    %17 = vector.load %arg4[%c3_9, %c0_10] : memref<9x512xf32, #tpu.memory_space<vmem>>, vector<1x512xf32>
    %18 = vector.broadcast %17 : vector<1x512xf32> to vector<3x512xf32>
    %19 = arith.mulf %16, %18 : vector<3x512xf32>
    %c9 = arith.constant 9 : index
    %c0_11 = arith.constant 0 : index
    %20 = vector.load %arg6[%c9, %c0_11] : memref<32x512xf32, #tpu.memory_space<vmem>>, vector<3x512xf32>
    tpu.vector_store %arg6[%c9, %c0_11], %19 {strides = array<i32>} : memref<32x512xf32, #tpu.memory_space<vmem>>, vector<3x512xf32>,
    %c12 = arith.constant 12 : index
    %c0_12 = arith.constant 0 : index
    %21 = vector.load %arg6[%c12, %c0_12] : memref<32x512xf32, #tpu.memory_space<vmem>>, vector<3x512xf32>
    tpu.vector_store %arg6[%c12, %c0_12], %0 {strides = array<i32>} : memref<32x512xf32, #tpu.memory_space<vmem>>, vector<3x512xf32>,
    %c511_i32 = arith.constant 511 : i32
    %22 = tpu.dynamic_rotate %0 by %c511_i32 dim 1 : vector<3x512xf32>, i32 -> vector<3x512xf32>
    %c5 = arith.constant 5 : index
    %c0_13 = arith.constant 0 : index
    %23 = vector.load %arg4[%c5, %c0_13] : memref<9x512xf32, #tpu.memory_space<vmem>>, vector<1x512xf32>
    %24 = vector.broadcast %23 : vector<1x512xf32> to vector<3x512xf32>
    %25 = arith.mulf %22, %24 : vector<3x512xf32>
    %c15 = arith.constant 15 : index
    %c0_14 = arith.constant 0 : index
    %26 = vector.load %arg6[%c15, %c0_14] : memref<32x512xf32, #tpu.memory_space<vmem>>, vector<3x512xf32>
    tpu.vector_store %arg6[%c15, %c0_14], %25 {strides = array<i32>} : memref<32x512xf32, #tpu.memory_space<vmem>>, vector<3x512xf32>,
    %c497_i32 = arith.constant 497 : i32
    %27 = tpu.dynamic_rotate %0 by %c497_i32 dim 1 : vector<3x512xf32>, i32 -> vector<3x512xf32>
    %c6_15 = arith.constant 6 : index
    %c0_16 = arith.constant 0 : index
    %28 = vector.load %arg4[%c6_15, %c0_16] : memref<9x512xf32, #tpu.memory_space<vmem>>, vector<1x512xf32>
    %29 = vector.broadcast %28 : vector<1x512xf32> to vector<3x512xf32>
    %30 = arith.mulf %27, %29 : vector<3x512xf32>
    %c18 = arith.constant 18 : index
    %c0_17 = arith.constant 0 : index
    %31 = vector.load %arg6[%c18, %c0_17] : memref<32x512xf32, #tpu.memory_space<vmem>>, vector<3x512xf32>
    tpu.vector_store %arg6[%c18, %c0_17], %30 {strides = array<i32>} : memref<32x512xf32, #tpu.memory_space<vmem>>, vector<3x512xf32>,
    %c496_i32 = arith.constant 496 : i32
    %32 = tpu.dynamic_rotate %0 by %c496_i32 dim 1 : vector<3x512xf32>, i32 -> vector<3x512xf32>
    %c7 = arith.constant 7 : index
    %c0_18 = arith.constant 0 : index
    %33 = vector.load %arg4[%c7, %c0_18] : memref<9x512xf32, #tpu.memory_space<vmem>>, vector<1x512xf32>
    %34 = vector.broadcast %33 : vector<1x512xf32> to vector<3x512xf32>
    %35 = arith.mulf %32, %34 : vector<3x512xf32>
    %c21 = arith.constant 21 : index
    %c0_19 = arith.constant 0 : index
    %36 = vector.load %arg6[%c21, %c0_19] : memref<32x512xf32, #tpu.memory_space<vmem>>, vector<3x512xf32>
    tpu.vector_store %arg6[%c21, %c0_19], %35 {strides = array<i32>} : memref<32x512xf32, #tpu.memory_space<vmem>>, vector<3x512xf32>,
    %c495_i32 = arith.constant 495 : i32
    %37 = tpu.dynamic_rotate %0 by %c495_i32 dim 1 : vector<3x512xf32>, i32 -> vector<3x512xf32>
    %c8 = arith.constant 8 : index
    %c0_20 = arith.constant 0 : index
    %38 = vector.load %arg4[%c8, %c0_20] : memref<9x512xf32, #tpu.memory_space<vmem>>, vector<1x512xf32>
    %39 = vector.broadcast %38 : vector<1x512xf32> to vector<3x512xf32>
    %40 = arith.mulf %37, %39 : vector<3x512xf32>
    %c24 = arith.constant 24 : index
    %c0_21 = arith.constant 0 : index
    %41 = vector.load %arg6[%c24, %c0_21] : memref<32x512xf32, #tpu.memory_space<vmem>>, vector<3x512xf32>
    tpu.vector_store %arg6[%c24, %c0_21], %40 {strides = array<i32>} : memref<32x512xf32, #tpu.memory_space<vmem>>, vector<3x512xf32>,
    %cst = arith.constant 1.000000e+00 : f32
    %42 = vector.broadcast %cst : f32 to vector<1x512xf32>
    %c27 = arith.constant 27 : index
    %c0_22 = arith.constant 0 : index
    %43 = vector.load %arg6[%c27, %c0_22] : memref<32x512xf32, #tpu.memory_space<vmem>>, vector<1x512xf32>
    tpu.vector_store %arg6[%c27, %c0_22], %42 {strides = array<i32>} : memref<32x512xf32, #tpu.memory_space<vmem>>, vector<1x512xf32>,
    %cst_23 = arith.constant 0.000000e+00 : f32
    %44 = vector.broadcast %cst_23 : f32 to vector<4x512xf32>
    %c28 = arith.constant 28 : index
    %c0_24 = arith.constant 0 : index
    %45 = vector.load %arg6[%c28, %c0_24] : memref<32x512xf32, #tpu.memory_space<vmem>>, vector<4x512xf32>
    tpu.vector_store %arg6[%c28, %c0_24], %44 {strides = array<i32>} : memref<32x512xf32, #tpu.memory_space<vmem>>, vector<4x512xf32>,
    %c0_25 = arith.constant 0 : index
    %c0_26 = arith.constant 0 : index
    %46 = vector.load %arg2[%c0_25, %c0_26] : memref<8x512xf32, #tpu.memory_space<vmem>>, vector<8x512xf32>
    %c0_27 = arith.constant 0 : index
    %c0_28 = arith.constant 0 : index
    %47 = vector.load %arg3[%c0_27, %c0_28] : memref<8x32xf32, #tpu.memory_space<vmem>>, vector<8x32xf32>
    %c0_29 = arith.constant 0 : index
    %c0_30 = arith.constant 0 : index
    %48 = vector.load %arg6[%c0_29, %c0_30] : memref<32x512xf32, #tpu.memory_space<vmem>>, vector<32x512xf32>
    %cst_31 = arith.constant dense<0.000000e+00> : vector<8x512xf32>
    %49 = tpu.matmul %47, %48, %cst_31 {dimension_numbers = #tpu.dot_dimension_numbers<[1], [0], [0], [1], [0, 0, 1, 1], [], []>} : vector<8x32xf32>, vector<32x512xf32>, vector<8x512xf32> -> vector<8x512xf32>
    %50 = arith.addf %46, %49 : vector<8x512xf32>
    %51 = arith.fptosi %50 : vector<8x512xf32> to vector<8x512xi32>
    %52 = tpu.iota {dimensions = array<i32: 0>} : vector<8x8xi32>
    %53 = tpu.iota {dimensions = array<i32: 1>} : vector<8x8xi32>
    %54 = arith.cmpi sle, %53, %52 : vector<8x8xi32>
    %55 = arith.extui %54 : vector<8x8xi1> to vector<8x8xi32>
    %56 = arith.sitofp %55 : vector<8x8xi32> to vector<8x8xf32>
    %57 = arith.sitofp %51 : vector<8x512xi32> to vector<8x512xf32>
    %cst_32 = arith.constant dense<0.000000e+00> : vector<8x512xf32>
    %58 = tpu.matmul %56, %57, %cst_32 {dimension_numbers = #tpu.dot_dimension_numbers<[1], [0], [0], [1], [0, 0, 1, 1], [], []>} : vector<8x8xf32>, vector<8x512xf32>, vector<8x512xf32> -> vector<8x512xf32>
    %59 = arith.fptosi %58 : vector<8x512xf32> to vector<8x512xi32>
    %c0_33 = arith.constant 0 : index
    %c0_34 = arith.constant 0 : index
    %60 = vector.load %arg5[%c0_33, %c0_34] : memref<8x512xi32, #tpu.memory_space<vmem>>, vector<8x512xi32>
    tpu.vector_store %arg5[%c0_33, %c0_34], %59 {strides = array<i32>} : memref<8x512xi32, #tpu.memory_space<vmem>>, vector<8x512xi32>,
    return
  }
  func.func @transform_0(%arg0: i32) -> (i32, i32) {
    %c0_i32 = arith.constant 0 : i32
    %c0_i32_0 = arith.constant 0 : i32
    return %c0_i32, %arg0 : i32, i32
  }
  func.func @transform_1(%arg0: i32) -> (i32, i32) {
    %c0_i32 = arith.constant 0 : i32
    %c0_i32_0 = arith.constant 0 : i32
    return %c0_i32, %arg0 : i32, i32
  }
  func.func @transform_2(%arg0: i32) -> (i32, i32) {
    %c0_i32 = arith.constant 0 : i32
    %c0_i32_0 = arith.constant 0 : i32
    %c0_i32_1 = arith.constant 0 : i32
    return %c0_i32, %c0_i32_0 : i32, i32
  }
  func.func @transform_3(%arg0: i32) -> (i32, i32) {
    %c0_i32 = arith.constant 0 : i32
    %c0_i32_0 = arith.constant 0 : i32
    %c0_i32_1 = arith.constant 0 : i32
    return %c0_i32, %c0_i32_0 : i32, i32
  }
  func.func @transform_4(%arg0: i32) -> (i32, i32) {
    %c0_i32 = arith.constant 0 : i32
    %c0_i32_0 = arith.constant 0 : i32
    return %c0_i32, %arg0 : i32, i32
  }
}

</mosaic_0001>

<bundles_post_ra>
// kernel: model_forward.1
= control target key start
LH: loop header
LB: loop body
LE: loop exit
PB: predicated region body
PF: predicated region fallthrough
CT: control target
= control target key end

     0   :  { %s877_s19 = smov 16   ;;  %s878_s20 = smov 15   ;;  %v33_v6 = vlaneseq  ;;  %v883_v7 = vmov 1.0   ;;  %v884_v8 = vmov 0.0   ;;  %vm498_vm9 = vcmask 261120   ;;  %s1092_s0 = inlined_call_operand.vmem [shape: f32[3,512], index: 0, kind: input, shape index: {}]   ;;  %s1093_s3 = inlined_call_operand.vmem [shape: f32[9,512], index: 3, kind: input, shape index: {}]   ;;  %s1094_s2 = inlined_call_operand.vmem [shape: f32[8,32], index: 2, kind: input, shape index: {}]   ;;  %s1095_s1 = inlined_call_operand.vmem [shape: f32[8,512], index: 1, kind: input, shape index: {}]   ;;  %s1096_s4 = inlined_call_operand.vmem [shape: s32[8,512], index: 4, kind: output, shape index: {}]  }
   0x1   :  { %v18_v0 = vld [vmem:[%s1092_s0 + $0x8] sm:$0x77]  ;;  %v17_v1 = vld [vmem:[%s1092_s0] sm:$0x77]  ;;  %s879_s21 = smov 1   ;;  %s880_s0 = smov 127   ;;  %566 = vmatprep.mubr.f32.mxu0 %v884_v8  ;;  %637 = vmatprep.mubr.f32.mxu1 %v884_v8 }
   0x2   :  { %74 = vrot.lane.b32.xlu1 %v18_v0, %s877_s19  ;;  %249 = vst [vmem:[#allocation2 + $0x38] sm:$0x70] %v18_v0  ;;  %70 = vrot.lane.b32.xlu0 %v17_v1, %s877_s19  ;;  %247 = vst [vmem:[#allocation2 + $0x28] sm:$0x70] %v17_v1  ;;  %v22_v2 = vcombine.high %v18_v0, %v18_v0  ;;  %v21_v3 = vcombine.high %v17_v1, %v17_v1  ;;  %s881_s22 = smov 17   ;;  %s882_s23 = smov 113  }
   0x3   :  { %v242_v4 = vcombine.low %v17_v1, %v17_v1  ;;  %v243_v5 = vcombine.low %v18_v0, %v18_v0  ;;  %vm468_vm0 = vcmp.lt.s32.totalorder %v33_v6, 512  ;;  %474 = vst [vmem:[#allocation2 + $0x68] sm:$0xf0] %v884_v8  ;;  %473 = vst [vmem:[#allocation2 + $0x60] sm:$0xf0] %v884_v8  ;;  %s885_s24 = smov 112  }
   0x4   :  { %471 = vst.msk [vmem:[#allocation2 + $0x63] ss:$8 sm:$0xf] %vm468_vm0, %v883_v7  ;;  %475 = vst [vmem:[#allocation2 + $0x70] sm:$0xf0] %v884_v8  ;;  %s886_s25 = smov 111  }
   0x5   :  { %246 = vst [vmem:[#allocation2 + $0x20] sm:$0x70] %v242_v4  ;;  %248 = vst [vmem:[#allocation2 + $0x30] sm:$0x70] %v243_v5  ;;  %v924_v9 = vshrl.u32 %v33_v6, 7  ;;  %v926_v10 = vand.u32 127, %v33_v6 }
   0x6   :  { %76 = vrot.lane.b32.xlu1 %v22_v2, %s877_s19  ;;  %72 = vrot.lane.b32.xlu0 %v21_v3, %s877_s19  ;;  %476 = vst [vmem:[#allocation2 + $0x78] sm:$0xf0] %v884_v8  ;;  %v819_v15 = vld [vmem:[%s1093_s3 + $0x1] ss:$8 sm:$0xf]  ;;  %vm661_vm11 = vcmask 64512  }
   0x7   :  { %v929_v11 = vsub.s32 0, %v924_v9  ;;  %v932_v12 = vsub.s32 3, %v924_v9  ;;  %v935_v13 = vsub.s32 1, %v924_v9  ;;  %v938_v14 = vsub.s32 2, %v924_v9 }
   0x8   :  { %vm78_vm1 = vcmp.lt.s32.totalorder %v926_v10, 16  ;;  %v820_v18 = vld [vmem:[%s1093_s3 + $0x2] ss:$8 sm:$0xf]  ;;  %vm134_vm2 = vcmp.lt.s32.totalorder %v926_v10, 15  ;;  %vm194_vm3 = vcmp.lt.s32.totalorder %v926_v10, 1  ;;  %vm654_vm10 = vcmp.le.s32.totalorder %v926_v10, %v924_v9 }
   0x9   :  { %v89_v19 = vrot.slane %v819_v15, %v929_v11  ;;  %v101_v20 = vrot.slane %v819_v15, %v932_v12  ;;  %v93_v21 = vrot.slane %v819_v15, %v935_v13  ;;  %v97_v22 = vrot.slane %v819_v15, %v938_v14  ;;  %v821_v45 = vld [vmem:[%s1093_s3 + $0x3] ss:$8 sm:$0xf] }
   0xa   :  { %128 = vrot.lane.b32.xlu1 %v21_v3, %s878_s20  ;;  %126 = vrot.lane.b32.xlu0 %v17_v1, %s878_s20  ;;  %v149_v25 = vrot.slane %v820_v18, %v935_v13  ;;  %v145_v42 = vrot.slane %v820_v18, %v929_v11  ;;  %v153_v43 = vrot.slane %v820_v18, %v938_v14  ;;  %vm258_vm4 = vcmp.lt.s32.totalorder %v926_v10, 127 }
   0xb   :  { %v157_v44 = vrot.slane %v820_v18, %v932_v12  ;;  %v209_v55 = vrot.slane %v821_v45, %v935_v13  ;;  %v205_v63 = vrot.slane %v821_v45, %v929_v11  ;;  %vm35_vm5 = vcmp.lt.s32.totalorder %v926_v10, 17 }
   0xc   :  { %vm318_vm6 = vcmp.lt.s32.totalorder %v926_v10, 113  ;;  %vm374_vm7 = vcmp.lt.s32.totalorder %v926_v10, 112  ;;  %vm430_vm8 = vcmp.lt.s32.totalorder %v926_v10, 111 }
   0xe   :  { %132 = vrot.lane.b32.xlu1 %v22_v2, %s878_s20  ;;  %130 = vrot.lane.b32.xlu0 %v18_v0, %s878_s20 }
  0x12   :  { %188 = vrot.lane.b32.xlu1 %v21_v3, %s879_s21  ;;  %186 = vrot.lane.b32.xlu0 %v17_v1, %s879_s21 }
  0x16   :  { %192 = vrot.lane.b32.xlu1 %v22_v2, %s879_s21  ;;  %190 = vrot.lane.b32.xlu0 %v18_v0, %s879_s21 }
  0x1a   :  { %252 = vrot.lane.b32.xlu1 %v21_v3, %s880_s0  ;;  %250 = vrot.lane.b32.xlu0 %v17_v1, %s880_s0 }
  0x1e   :  { %256 = vrot.lane.b32.xlu1 %v22_v2, %s880_s0  ;;  %254 = vrot.lane.b32.xlu0 %v18_v0, %s880_s0 }
  0x22   :  { %27 = vrot.lane.b32.xlu1 %v21_v3, %s881_s22  ;;  %25 = vrot.lane.b32.xlu0 %v17_v1, %s881_s22 }
  0x26   :  { %31 = vrot.lane.b32.xlu1 %v22_v2, %s881_s22  ;;  %29 = vrot.lane.b32.xlu0 %v18_v0, %s881_s22 }
  0x2a   :  { %312 = vrot.lane.b32.xlu1 %v21_v3, %s882_s23  ;;  %310 = vrot.lane.b32.xlu0 %v17_v1, %s882_s23 }
  0x2e   :  { %316 = vrot.lane.b32.xlu1 %v22_v2, %s882_s23  ;;  %314 = vrot.lane.b32.xlu0 %v18_v0, %s882_s23 }
  0x32   :  { %368 = vrot.lane.b32.xlu1 %v21_v3, %s885_s24  ;;  %366 = vrot.lane.b32.xlu0 %v17_v1, %s885_s24 }
  0x36   :  { %372 = vrot.lane.b32.xlu1 %v22_v2, %s885_s24  ;;  %370 = vrot.lane.b32.xlu0 %v18_v0, %s885_s24 }
  0x3a   :  { %424 = vrot.lane.b32.xlu1 %v21_v3, %s886_s25  ;;  %422 = vrot.lane.b32.xlu0 %v17_v1, %s886_s25  ;;  %v217_v1 = vrot.slane %v821_v45, %v932_v12 }
  0x3e   :  { %428 = vrot.lane.b32.xlu1 %v22_v2, %s886_s25  ;;  %426 = vrot.lane.b32.xlu0 %v18_v0, %s886_s25  ;;  %v213_v0 = vrot.slane %v821_v45, %v938_v14  ;;  %v822_v2 = vld [vmem:[%s1093_s3 + $0x5] ss:$8 sm:$0xf] }
  0x74   :  { %v75_v16 = vpop.permute.xlu1 %74  ;;  %v71_v17 = vpop.permute.xlu0 %70 }
  0x78   :  { %v77_v23 = vpop.permute.xlu1 %76  ;;  %v73_v24 = vpop.permute.xlu0 %72 }
  0x79   :  { %v79_v26 = vsel %vm78_vm1, %v75_v16, %v77_v23  ;;  %v82_v27 = vsel %vm78_vm1, %v77_v23, %v71_v17  ;;  %v80_v28 = vsel %vm78_vm1, %v73_v24, %v75_v16  ;;  %v81_v29 = vsel %vm78_vm1, %v71_v17, %v73_v24 }
  0x7a   :  { %v106_v30 = vmul.f32 %v89_v19, %v82_v27  ;;  %v109_v31 = vmul.f32 %v101_v20, %v79_v26  ;;  %v107_v32 = vmul.f32 %v93_v21, %v81_v29  ;;  %v108_v33 = vmul.f32 %v97_v22, %v80_v28 }
  0x7b   :  { %v269_v19 = vrot.slane %v822_v2, %v929_v11  ;;  %v281_v27 = vrot.slane %v822_v2, %v932_v12  ;;  %v273_v28 = vrot.slane %v822_v2, %v935_v13  ;;  %v277_v29 = vrot.slane %v822_v2, %v938_v14 }
  0x7c   :  { %v114_v34 = vrot.slane %v106_v30, 5  ;;  %v117_v35 = vrot.slane %v109_v31, 5  ;;  %v115_v36 = vrot.slane %v107_v32, 5  ;;  %v116_v37 = vrot.slane %v108_v33, 5  ;;  %v129_v38 = vpop.permute.xlu1 %128  ;;  %v127_v39 = vpop.permute.xlu0 %126 }
  0x7d   :  { %v137_v40 = vsel %vm134_vm2, %v127_v39, %v129_v38  ;;  %v40_v30 = vld [vmem:[%s1093_s3] ss:$8 sm:$0xf] }
  0x7e   :  { %122 = vst [vmem:[#allocation2] sm:$0x38] %v114_v34  ;;  %125 = vst [vmem:[#allocation2 + $0x18] sm:$0x38] %v117_v35  ;;  %v163_v41 = vmul.f32 %v149_v25, %v137_v40  ;;  %v49_v40 = vrot.slane %v40_v30, %v935_v13 }
  0x7f   :  { %123 = vst [vmem:[#allocation2 + $0x8] sm:$0x38] %v115_v36  ;;  %124 = vst [vmem:[#allocation2 + $0x10] sm:$0x38] %v116_v37 }
  0x80   :  { %v171_v46 = vrot.slane %v163_v41, 2  ;;  %v133_v47 = vpop.permute.xlu1 %132  ;;  %v131_v48 = vpop.permute.xlu0 %130 }
  0x81   :  { %v138_v49 = vsel %vm134_vm2, %v133_v47, %v127_v39  ;;  %v135_v50 = vsel %vm134_vm2, %v131_v48, %v133_v47  ;;  %v136_v51 = vsel %vm134_vm2, %v129_v38, %v131_v48  ;;  %v45_v48 = vrot.slane %v40_v30, %v929_v11 }
  0x82   :  { %179 = vst [vmem:[#allocation2 + $0x28] ss:$-28 sps:$4 sm:$0xc1] %v171_v46   ;;  %v162_v52 = vmul.f32 %v145_v42, %v138_v49  ;;  %v164_v53 = vmul.f32 %v153_v43, %v136_v51  ;;  %v165_v54 = vmul.f32 %v157_v44, %v135_v50  ;;  %v53_v49 = vrot.slane %v40_v30, %v938_v14  ;;  %v823_v51 = vld [vmem:[%s1093_s3 + $0x6] ss:$8 sm:$0xf] }
  0x83   :  { %v57_v50 = vrot.slane %v40_v30, %v932_v12  ;;  %v333_v2 = vrot.slane %v823_v51, %v935_v13 }
  0x84   :  { %v170_v56 = vrot.slane %v162_v52, 2  ;;  %v172_v57 = vrot.slane %v164_v53, 2  ;;  %v173_v58 = vrot.slane %v165_v54, 2  ;;  %v189_v59 = vpop.permute.xlu1 %188  ;;  %v187_v60 = vpop.permute.xlu0 %186 }
  0x85   :  { %v197_v61 = vsel %vm194_vm3, %v187_v60, %v189_v59 }
  0x86   :  { %178 = vst [vmem:[#allocation2 + $0x20] ss:$-28 sps:$4 sm:$0xc1] %v170_v56   ;;  %180 = vst [vmem:[#allocation2 + $0x30] ss:$-28 sps:$4 sm:$0xc1] %v172_v57   ;;  %v223_v62 = vmul.f32 %v209_v55, %v197_v61 }
  0x87   :  { %181 = vst [vmem:[#allocation2 + $0x38] ss:$-28 sps:$4 sm:$0xc1] %v173_v58  }
  0x88   :  { %v231_v3 = vrot.slane %v223_v62, 7  ;;  %v193_v4 = vpop.permute.xlu1 %192  ;;  %v191_v5 = vpop.permute.xlu0 %190 }
  0x89   :  { %v198_v6 = vsel %vm194_vm3, %v193_v4, %v187_v60  ;;  %v195_v7 = vsel %vm194_vm3, %v191_v5, %v193_v4  ;;  %v196_v15 = vsel %vm194_vm3, %v189_v59, %v191_v5  ;;  %v329_v60 = vrot.slane %v823_v51, %v929_v11 }
  0x8a   :  { %239 = vst [vmem:[#allocation2 + $0x28] sm:$0xe] %v231_v3  ;;  %v222_v16 = vmul.f32 %v205_v63, %v198_v6  ;;  %v224_v17 = vmul.f32 %v213_v0, %v196_v15  ;;  %v225_v18 = vmul.f32 %v217_v1, %v195_v7  ;;  %v341_v1 = vrot.slane %v823_v51, %v932_v12  ;;  %v824_v6 = vld [vmem:[%s1093_s3 + $0x7] ss:$8 sm:$0xf] }
  0x8b   :  { %v337_v3 = vrot.slane %v823_v51, %v938_v14 }
  0x8c   :  { %v230_v20 = vrot.slane %v222_v16, 7  ;;  %v232_v21 = vrot.slane %v224_v17, 7  ;;  %v233_v22 = vrot.slane %v225_v18, 7  ;;  %v253_v23 = vpop.permute.xlu1 %252  ;;  %v251_v24 = vpop.permute.xlu0 %250 }
  0x8d   :  { %v261_v25 = vsel %vm258_vm4, %v251_v24, %v253_v23 }
  0x8e   :  { %238 = vst [vmem:[#allocation2 + $0x20] sm:$0xe] %v230_v20  ;;  %240 = vst [vmem:[#allocation2 + $0x30] sm:$0xe] %v232_v21  ;;  %v286_v26 = vmul.f32 %v269_v19, %v261_v25 }
  0x8f   :  { %241 = vst [vmem:[#allocation2 + $0x38] sm:$0xe] %v233_v22 }
  0x90   :  { %v294_v31 = vrot.slane %v286_v26, 1  ;;  %v257_v32 = vpop.permute.xlu1 %256  ;;  %v255_v33 = vpop.permute.xlu0 %254 }
  0x91   :  { %v262_v34 = vsel %vm258_vm4, %v257_v32, %v251_v24  ;;  %v259_v35 = vsel %vm258_vm4, %v255_v33, %v257_v32  ;;  %v260_v36 = vsel %vm258_vm4, %v253_v23, %v255_v33  ;;  %v385_v24 = vrot.slane %v824_v6, %v929_v11 }
  0x92   :  { %302 = vst [vmem:[#allocation2 + $0x40] ss:$-28 sps:$4 sm:$0x83] %v294_v31   ;;  %v289_v37 = vmul.f32 %v281_v27, %v262_v34  ;;  %v287_v38 = vmul.f32 %v273_v28, %v260_v36  ;;  %v288_v39 = vmul.f32 %v277_v29, %v259_v35 }
  0x94   :  { %v297_v41 = vrot.slane %v289_v37, 1  ;;  %v295_v42 = vrot.slane %v287_v38, 1  ;;  %v296_v43 = vrot.slane %v288_v39, 1  ;;  %v28_v44 = vpop.permute.xlu1 %27  ;;  %v26_v45 = vpop.permute.xlu0 %25 }
  0x95   :  { %v38_v46 = vsel %vm35_vm5, %v26_v45, %v28_v44 }
  0x96   :  { %305 = vst [vmem:[#allocation2 + $0x58] ss:$-28 sps:$4 sm:$0x83] %v297_v41   ;;  %303 = vst [vmem:[#allocation2 + $0x48] ss:$-28 sps:$4 sm:$0x83] %v295_v42   ;;  %v63_v47 = vmul.f32 %v49_v40, %v38_v46  ;;  %v397_v41 = vrot.slane %v824_v6, %v932_v12  ;;  %v389_v42 = vrot.slane %v824_v6, %v935_v13 }
  0x97   :  { %304 = vst [vmem:[#allocation2 + $0x50] ss:$-28 sps:$4 sm:$0x83] %v296_v43   ;;  %v393_v43 = vrot.slane %v824_v6, %v938_v14 }
  0x98   :  { %67 = vst [vmem:[#allocation2 + $0x8] sm:$0x7] %v63_v47  ;;  %v32_v52 = vpop.permute.xlu1 %31  ;;  %v30_v53 = vpop.permute.xlu0 %29 }
  0x99   :  { %v39_v54 = vsel %vm35_vm5, %v32_v52, %v26_v45  ;;  %v36_v55 = vsel %vm35_vm5, %v30_v53, %v32_v52  ;;  %v37_v56 = vsel %vm35_vm5, %v28_v44, %v30_v53  ;;  %v486_v25 = vld [vmem:[#allocation2 + $0x20] sm:$0xff] }
  0x9a   :  { %v62_v57 = vmul.f32 %v45_v48, %v39_v54  ;;  %v64_v58 = vmul.f32 %v53_v49, %v37_v56  ;;  %v65_v59 = vmul.f32 %v57_v50, %v36_v55  ;;  %v825_v44 = vld [vmem:[%s1093_s3 + $0x20] ss:$8 sm:$0xf] }
  0x9b   :  { %v441_v54 = vrot.slane %v825_v44, %v929_v11 }
  0x9c   :  { %66 = vst [vmem:[#allocation2] sm:$0x7] %v62_v57  ;;  %68 = vst [vmem:[#allocation2 + $0x10] sm:$0x7] %v64_v58  ;;  %v313_v61 = vpop.permute.xlu1 %312  ;;  %v311_v62 = vpop.permute.xlu0 %310 }
  0x9d   :  { %69 = vst [vmem:[#allocation2 + $0x18] sm:$0x7] %v65_v59  ;;  %v321_v63 = vsel %vm318_vm6, %v311_v62, %v313_v61  ;;  %v487_v5 = vld [vmem:[#allocation2 + $0x28] sm:$0xff]  ;;  %v489_v35 = vld [vmem:[#allocation2 + $0x38] sm:$0xff] }
  0x9e   :  { %v346_v0 = vmul.f32 %v329_v60, %v321_v63  ;;  %v488_v36 = vld [vmem:[#allocation2 + $0x30] sm:$0xff]  ;;  %v445_v63 = vrot.slane %v825_v44, %v935_v13 }
  0x9f   :  { %v483_v4 = vld [vmem:[#allocation2 + $0x8] sm:$0xff] }
  0xa0   :  { %v354_v7 = vrot.slane %v346_v0, 6  ;;  %v317_v15 = vpop.permute.xlu1 %316  ;;  %v315_v16 = vpop.permute.xlu0 %314  ;;  %v831_v17 = vpack.c.bf16 %v487_v5, %v483_v4  ;;  %v449_v0 = vrot.slane %v825_v44, %v938_v14 }
  0xa1   :  { %v322_v18 = vsel %vm318_vm6, %v317_v15, %v311_v62  ;;  %v319_v19 = vsel %vm318_vm6, %v315_v16, %v317_v15  ;;  %v320_v20 = vsel %vm318_vm6, %v313_v61, %v315_v16  ;;  %v453_v62 = vrot.slane %v825_v44, %v932_v12 }
  0xa2   :  { %362 = vst [vmem:[#allocation2 + $0x40] sm:$0x1c] %v354_v7  ;;  %v349_v21 = vmul.f32 %v341_v1, %v322_v18  ;;  %v347_v22 = vmul.f32 %v333_v2, %v320_v20  ;;  %v348_v23 = vmul.f32 %v337_v3, %v319_v19  ;;  %832 = vmatprep.subr.bf16.mxu0 %v831_v17 }
  0xa3   :  { %v482_v26 = vld [vmem:[#allocation2] sm:$0xff]  ;;  %v484_v28 = vld [vmem:[#allocation2 + $0x10] sm:$0xff] }
  0xa4   :  { %v485_v27 = vld [vmem:[#allocation2 + $0x18] sm:$0xff]  ;;  %v357_v29 = vrot.slane %v349_v21, 6  ;;  %v355_v30 = vrot.slane %v347_v22, 6  ;;  %v356_v31 = vrot.slane %v348_v23, 6  ;;  %v369_v32 = vpop.permute.xlu1 %368  ;;  %v367_v33 = vpop.permute.xlu0 %366  ;;  %v833_v34 = vpack.c.bf16 %v486_v25, %v482_v26  ;;  %v477_v25 = vld [vmem:[%s1095_s1] sm:$0xff]  ;;  %v479_v26 = vld [vmem:[%s1095_s1 + $0x10] sm:$0xff] }
  0xa5   :  { %v377_v37 = vsel %vm374_vm7, %v367_v33, %v369_v32  ;;  %v839_v38 = vpack.c.bf16 %v489_v35, %v485_v27  ;;  %v841_v39 = vpack.c.bf16 %v488_v36, %v484_v28  ;;  %v478_v27 = vld [vmem:[%s1095_s1 + $0x8] sm:$0xff]  ;;  %v480_v28 = vld [vmem:[%s1095_s1 + $0x18] sm:$0xff] }
  0xa6   :  { %365 = vst [vmem:[#allocation2 + $0x58] sm:$0x1c] %v357_v29  ;;  %363 = vst [vmem:[#allocation2 + $0x48] sm:$0x1c] %v355_v30  ;;  %v402_v40 = vmul.f32 %v385_v24, %v377_v37  ;;  %834 = vmatpush1.bf16.msra.mxu0 %v833_v34  ;;  %v481_v24 = vld [vmem:[%s1094_s2] sm:$0xff] }
  0xa7   :  { %364 = vst [vmem:[#allocation2 + $0x50] sm:$0x1c] %v356_v31  ;;  %840 = vmatprep.subr.bf16.mxu1 %v839_v38 }
  0xa8   :  { %v410_v45 = vrot.slane %v402_v40, 3  ;;  %842 = vmatpush1.bf16.msra.mxu1 %v841_v39  ;;  %v373_v46 = vpop.permute.xlu1 %372  ;;  %v371_v47 = vpop.permute.xlu0 %370 }
  0xa9   :  { %v378_v48 = vsel %vm374_vm7, %v373_v46, %v367_v33  ;;  %v375_v49 = vsel %vm374_vm7, %v371_v47, %v373_v46  ;;  %v376_v50 = vsel %vm374_vm7, %v369_v32, %v371_v47 }
  0xaa   :  { %418 = vst [vmem:[#allocation2 + $0x40] sm:$0xe0] %v410_v45  ;;  %v405_v51 = vmul.f32 %v397_v41, %v378_v48  ;;  %v403_v52 = vmul.f32 %v389_v42, %v376_v50  ;;  %v404_v53 = vmul.f32 %v393_v43, %v375_v49  ;;  %v828_v49 = vsel %vm654_vm10, 1.0, %v884_v8 }
  0xac   :  { %v413_v55 = vrot.slane %v405_v51, 3  ;;  %v411_v56 = vrot.slane %v403_v52, 3  ;;  %v412_v57 = vrot.slane %v404_v53, 3  ;;  %v425_v58 = vpop.permute.xlu1 %424  ;;  %v423_v59 = vpop.permute.xlu0 %422 }
  0xad   :  { %v433_v60 = vsel %vm430_vm8, %v423_v59, %v425_v58 }
  0xae   :  { %421 = vst [vmem:[#allocation2 + $0x58] sm:$0xe0] %v413_v55  ;;  %419 = vst [vmem:[#allocation2 + $0x48] sm:$0xe0] %v411_v56  ;;  %v458_v61 = vmul.f32 %v441_v54, %v433_v60 }
  0xaf   :  { %420 = vst [vmem:[#allocation2 + $0x50] sm:$0xe0] %v412_v57 }
  0xb0   :  { %462 = vst [vmem:[#allocation2 + $0x60] sm:$0x7] %v458_v61  ;;  %v429_v11 = vpop.permute.xlu1 %428  ;;  %v427_v1 = vpop.permute.xlu0 %426 }
  0xb1   :  { %v434_v2 = vsel %vm430_vm8, %v429_v11, %v423_v59  ;;  %v431_v3 = vsel %vm430_vm8, %v427_v1, %v429_v11  ;;  %v432_v4 = vsel %vm430_vm8, %v425_v58, %v427_v1  ;;  %v490_v21 = vld [vmem:[#allocation2 + $0x40] sm:$0xff] }
  0xb2   :  { %v461_v5 = vmul.f32 %v453_v62, %v434_v2  ;;  %v459_v6 = vmul.f32 %v445_v63, %v432_v4  ;;  %v460_v7 = vmul.f32 %v449_v0, %v431_v3 }
  0xb4   :  { %465 = vst [vmem:[#allocation2 + $0x78] sm:$0x7] %v461_v5  ;;  %463 = vst [vmem:[#allocation2 + $0x68] sm:$0x7] %v459_v6 }
  0xb5   :  { %464 = vst [vmem:[#allocation2 + $0x70] sm:$0x7] %v460_v7  ;;  %v491_v12 = vld [vmem:[#allocation2 + $0x48] sm:$0xff]  ;;  %v493_v13 = vld [vmem:[#allocation2 + $0x58] sm:$0xff] }
  0xb6   :  { %v492_v15 = vld [vmem:[#allocation2 + $0x50] sm:$0xff] }
  0xb7   :  { %v494_v14 = vld [vmem:[#allocation2 + $0x60] sm:$0xff] }
  0xb8   :  { %v837_v23 = vpack.c.bf16 %v494_v14, %v490_v21 }
  0xbb   :  { %v495_v16 = vld [vmem:[#allocation2 + $0x68] sm:$0xff]  ;;  %v497_v17 = vld [vmem:[#allocation2 + $0x78] sm:$0xff] }
  0xbc   :  { %v496_v18 = vld [vmem:[#allocation2 + $0x70] sm:$0xff]  ;;  %v835_v19 = vpack.c.bf16 %v495_v16, %v491_v12  ;;  %v843_v20 = vpack.c.bf16 %v497_v17, %v493_v13 }
  0xbd   :  { %v845_v22 = vpack.c.bf16 %v496_v18, %v492_v15 }
  0xbe   :  { %836 = vmatprep.subr.bf16.mxu0 %v835_v19  ;;  %844 = vmatprep.subr.bf16.mxu1 %v843_v20 }
  0xbf   :  { %838 = vmatpush1.bf16.msra.mxu0 %v837_v23  ;;  %846 = vmatpush1.bf16.msra.mxu1 %v845_v22 }
  0xc2   :  { %826 = vmatmul.mubr.msk.f32.vlgmr.msra.gmra.mrb[0].mxu0 %vm498_vm9, %v481_v24  ;;  %827 = vmatmul.mubr.msk.f32.vlgmr.msra.gmra.mrb[0].mxu1 %vm498_vm9, %v481_v24 }
  0xc3   :  { %729 = vmatprep.mubr.f32.mxu0 %v884_v8  ;;  %800 = vmatprep.mubr.f32.mxu1 %v884_v8 }
 0x195   :  { %v568_v29 = vpop.f32.mrb[0].mxu0  ;;  %v639_v30 = vpop.f32.mrb[0].mxu1 }
 0x196   :  { %v644_v31 = vadd.f32 %v568_v29, %v477_v25  ;;  %v646_v32 = vadd.f32 %v639_v30, %v479_v26  ;;  %v570_v33 = vpop.f32.mrb[1].mxu0  ;;  %v641_v34 = vpop.f32.mrb[1].mxu1 }
 0x197   :  { %v645_v35 = vadd.f32 %v570_v33, %v478_v27  ;;  %v647_v36 = vadd.f32 %v641_v34, %v480_v28 }
 0x198   :  { %v847_v37 = vtrunc.f32 %v644_v31  ;;  %v851_v38 = vtrunc.f32 %v646_v32 }
 0x199   :  { %v849_v39 = vtrunc.f32 %v645_v35  ;;  %v853_v40 = vtrunc.f32 %v647_v36 }
 0x19a   :  { %v848_v41 = vcvt.f32.s32 %v847_v37  ;;  %v852_v42 = vcvt.f32.s32 %v851_v38 }
 0x19b   :  { %v850_v43 = vcvt.f32.s32 %v849_v39  ;;  %v854_v44 = vcvt.f32.s32 %v853_v40 }
 0x19c   :  { %v657_v47 = vcvt.s32.f32 %v848_v41  ;;  %v659_v48 = vcvt.s32.f32 %v852_v42 }
 0x19d   :  { %v658_v45 = vcvt.s32.f32 %v850_v43  ;;  %v660_v46 = vcvt.s32.f32 %v854_v44 }
 0x19f   :  { %665 = vmatprep.subr.mxu0 %v658_v45  ;;  %736 = vmatprep.subr.mxu1 %v660_v46 }
 0x1a0   :  { %666 = vmatpush1.msra.mxu0 %v657_v47  ;;  %737 = vmatpush1.msra.mxu1 %v659_v48 }
 0x1a1   :  { %829 = vmatmul.mubr.msk.f32.vlgmr.msra.gmra.mrb[2].mxu0 %vm661_vm11, %v828_v49  ;;  %830 = vmatmul.mubr.msk.f32.vlgmr.msra.gmra.mrb[2].mxu1 %vm661_vm11, %v828_v49 }
 0x274   :  { %v731_v50 = vpop.f32.mrb[2].mxu0  ;;  %v802_v51 = vpop.f32.mrb[2].mxu1 }
 0x275   :  { %v855_v52 = vtrunc.f32 %v731_v50  ;;  %v859_v53 = vtrunc.f32 %v802_v51  ;;  %v733_v54 = vpop.f32.mrb[3].mxu0  ;;  %v804_v55 = vpop.f32.mrb[3].mxu1 }
 0x276   :  { %v857_v9 = vtrunc.f32 %v733_v54  ;;  %v861_v10 = vtrunc.f32 %v804_v55 }
 0x277   :  { %v856_v56 = vcvt.f32.s32 %v855_v52  ;;  %v860_v57 = vcvt.f32.s32 %v859_v53 }
 0x278   :  { %v858_v58 = vcvt.f32.s32 %v857_v9  ;;  %v862_v59 = vcvt.f32.s32 %v861_v10 }
 0x279   :  { %811 = vst [vmem:[%s1096_s4] sm:$0xff] %v856_v56  ;;  %813 = vst [vmem:[%s1096_s4 + $0x10] sm:$0xff] %v860_v57 }
 0x27a   :  { %812 = vst [vmem:[%s1096_s4 + $0x8] sm:$0xff] %v858_v58  ;;  %814 = vst [vmem:[%s1096_s4 + $0x18] sm:$0xff] %v862_v59 }

</bundles_post_ra>
